<compile_context>
chip_gen: v6e
topology: v6e:2x2x1
jax: 0.10.0
libtpu: 0.0.40
codegen_flags: <defaults>
</compile_context>

<pallas_src>
import functools

import jax
import jax.numpy as jnp
from jax import lax
from jax.experimental import pallas as pl
from jax.experimental.pallas import tpu as pltpu

BN_EPS = 1e-6
_SINGLE_STEP_BYTES = 1 << 20     # sub-MiB problems: single reduction step is fine


def _round_up(x, m):
    return ((x + m - 1) // m) * m


@functools.lru_cache(maxsize=None)
def _vmem_budget_and_limit():
    """Generation-aware VMEM sizing.

    Returns (tiling budget, vmem_limit_bytes, two_tensorcores_guess).
    v5e/v6e have 128 MiB VMEM (1 TC); v7x-class has 64 MiB (2 TCs).
    """
    try:
        vmem = int(pltpu.get_tpu_info().vmem_capacity_bytes)
    except Exception:  # defensive: fall back to the most conservative assumption
        vmem = 64 * 1024 * 1024
    if vmem >= 128 * 1024 * 1024:          # v5e / v6e
        return 64 * 1024 * 1024, 100 * 1024 * 1024, False
    # v7x-class: smaller VMEM, two TensorCores per chip
    return 28 * 1024 * 1024, 48 * 1024 * 1024, True


def _divisors_128(n):
    """Descending 128-multiples that divide n (n must be a multiple of 128)."""
    q = n // 128
    return [128 * d for d in range(q, 0, -1) if q % d == 0]


def _pick_tile_linear(d_pad, per_col_bytes, budget_bytes, allow_single):
    """Largest 128-multiple divisor of d_pad with streamed cost within budget.

    Unless `allow_single`, prefer >=3 pipeline steps (then >=2) so DMA overlaps
    compute; prefer 256-multiples (v6e/v7x MXU is 2x256x256).
    """
    divs = _divisors_128(d_pad)
    fitting = [t for t in divs if t * per_col_bytes <= budget_bytes]
    if not fitting:
        return 128
    if allow_single:
        return fitting[0]
    for min_k in (3, 2):
        cands = [t for t in fitting if d_pad // t >= min_k]
        if cands:
            for t in cands:              # mild preference for 256-multiples
                if t % 256 == 0:
                    return t
            return cands[0]
    return fitting[-1]


def _pick_b_tiling(B, cap=512):
    """Choose (tile_b, B_padded).

    Full batch when small (block dim == array dim satisfies the (8,128) rule);
    otherwise a multiple of 8 <= cap with bounded zero-row padding so the
    (tile_b, tile_n) f32 accumulator stays small and pipelining is restored.
    """
    if B <= cap:
        return B, B
    max_waste = max(B // 8, 8)
    for t in range(cap, 7, -8):
        b_padded = _round_up(B, t)
        if b_padded - B <= max_waste:
            return t, b_padded
    return 8, _round_up(B, 8)


def _pick_tile_n(n_pad, tile_b, budget, want_two_blocks):
    """N tile budgeted jointly with tile_b (resident f32 accumulator)."""
    divs = _divisors_128(n_pad)
    fitting = [t for t in divs if t <= 2048 and 2 * tile_b * t * 4 <= budget // 3]
    if not fitting:
        fitting = [128]
    tile_n = fitting[0]
    if want_two_blocks and tile_n == n_pad and n_pad >= 256:
        # Give both v7x TensorCores work on the "parallel" N axis.
        for t in fitting:
            if t <= n_pad // 2:
                tile_n = t
                break
    return tile_n


# ----------------------------- kernels --------------------------------------


def _bn_normalize_kernel(x_ref, o_ref):
    """BatchNorm1d(affine=False), training mode: per-feature batch mean and
    *biased* variance over the full batch (block always spans the whole batch).
    Zero-padded feature columns normalize to exactly 0."""
    x = x_ref[...].astype(jnp.float32)
    mean = jnp.mean(x, axis=0, keepdims=True)
    xc = x - mean
    var = jnp.mean(xc * xc, axis=0, keepdims=True)
    o_ref[...] = (xc * lax.rsqrt(var + BN_EPS)).astype(o_ref.dtype)


def _gemm_bias_kernel(x_ref, w_ref, b_ref, o_ref, *, num_k):
    """grid = (B tiles ["parallel"], N tiles ["parallel"], K tiles ["arbitrary"])."""
    dot = jnp.dot(x_ref[...], w_ref[...], preferred_element_type=jnp.float32)
    if num_k == 1:
        # Single reduction step: skip the init/accumulate round-trip through the
        # VMEM accumulator (saves a full read+write pass over the out block).
        o_ref[...] = b_ref[...] + dot
    else:
        k = pl.program_id(2)

        @pl.when(k == 0)
        def _():
            o_ref[...] = jnp.broadcast_to(b_ref[...], o_ref.shape)

        o_ref[...] += dot


# ----------------------------- wrappers --------------------------------------


def prepare_linear_params(weight, bias, *, compute_dtype=jnp.bfloat16):
    """One-time weight/bias preparation (hoisted off the hot path).

    weight: (num_labels, D) PyTorch nn.Linear layout; bias: (num_labels,).
    Returns (w_t, b_pad, (D, num_labels)): W^T cast to compute_dtype with BOTH
    dims padded (D -> multiple of 128, N -> multiple of 128), bias -> (1, N_pad)
    in f32.  No weight padding ever happens per call.
    """
    num_labels, D = weight.shape
    d_pad = _round_up(D, 128)
    n_pad = _round_up(num_labels, 128)
    w_t = jnp.zeros((d_pad, n_pad), dtype=compute_dtype)
    w_t = w_t.at[:D, :num_labels].set(weight.T.astype(compute_dtype))
    b_vec = jnp.zeros((1, n_pad), dtype=jnp.float32)
    b_vec = b_vec.at[:, :num_labels].set(bias.astype(jnp.float32))
    return w_t, b_vec, (D, num_labels)


def linear_classifier_forward(x, w_t, b_vec, dims, *, add_batch_norm=False):
    """Pallas forward pass of LinearClassifier given prepared params.

    x:     (B, C, H, W) or (B, D) -- flattened to (B, D) like torch .view
    w_t:   (D_pad, N_pad) prepared weight (see prepare_linear_params)
    b_vec: (1, N_pad) prepared bias
    """
    D, num_labels = dims
    B = x.shape[0]
    x2d = x.reshape(B, -1)
    assert x2d.shape[1] == D, "feature dim mismatch"
    d_pad, n_pad = w_t.shape
    compute_dtype = w_t.dtype
    c_it = jnp.dtype(compute_dtype).itemsize

    if add_batch_norm and B < 2:
        # Matches PyTorch: BatchNorm1d in training mode rejects batch size 1.
        raise ValueError("BatchNorm1d in training mode requires batch size >= 2")

    budget, vmem_limit, two_cores = _vmem_budget_and_limit()

    # Feature-dim padding of x only (weight was padded once at prepare time).
    if d_pad != D:
        x2d = jnp.pad(x2d, ((0, 0), (0, d_pad - D)))

    # ---- BN prologue (Pallas) or plain cast: GEMM always streams compute_dtype x.
    if add_batch_norm:
        x_in_it = jnp.dtype(x2d.dtype).itemsize
        per_col = B * (2 * x_in_it + 2 * c_it + 8)       # in/out double-buffered + f32 temps
        allow_single = B * d_pad * (x_in_it + c_it) <= _SINGLE_STEP_BYTES
        tile_d_bn = _pick_tile_linear(d_pad, per_col, budget, allow_single)
        x_c = pl.pallas_call(
            _bn_normalize_kernel,
            out_shape=jax.ShapeDtypeStruct((B, d_pad), compute_dtype),
            grid_spec=pltpu.PrefetchScalarGridSpec(
                num_scalar_prefetch=0,
                grid=(d_pad // tile_d_bn,),
                in_specs=[pl.BlockSpec((B, tile_d_bn), lambda d: (0, d))],
                out_specs=pl.BlockSpec((B, tile_d_bn), lambda d: (0, d)),
            ),
            compiler_params=pltpu.CompilerParams(
                dimension_semantics=("parallel",),
                vmem_limit_bytes=vmem_limit,
            ),
            cost_estimate=pl.CostEstimate(
                flops=5 * B * d_pad,
                transcendentals=d_pad,
                bytes_accessed=B * d_pad * (x_in_it + c_it),
            ),
        )(x2d)
    else:
        x_c = x2d if x2d.dtype == compute_dtype else x2d.astype(compute_dtype)

    # ---- batch tiling / padding (padded zero rows produce bias-only rows, sliced off)
    tile_b, b_rows = _pick_b_tiling(B)
    if b_rows != B:
        x_c = jnp.pad(x_c, ((0, b_rows - B), (0, 0)))
    num_b = b_rows // tile_b

    # ---- N tiling, joint with tile_b; ensure >=2 parallel blocks on 2-TC chips
    want_split = two_cores and num_b == 1
    tile_n = _pick_tile_n(n_pad, tile_b, budget, want_split)
    num_n = n_pad // tile_n

    # ---- K (reduction) tiling: keep >=2 (ideally 3-8) steps for real problems
    out_bytes = 2 * tile_b * tile_n * 4 + 2 * tile_n * 4    # accumulator + bias blocks
    head = tile_b * tile_n * 4                              # dot temporary headroom
    per_col = 2 * (tile_b * c_it + tile_n * c_it)           # double-buffered x & W columns
    streamed = b_rows * d_pad * c_it + d_pad * n_pad * c_it
    allow_single = streamed <= _SINGLE_STEP_BYTES
    tile_d = _pick_tile_linear(d_pad, per_col, budget - out_bytes - head, allow_single)
    num_k = d_pad // tile_d

    # Deeper W buffering for small-batch, many-K-step shapes (hides HBM jitter
    # on the dominant weight stream) -- only when the extra buffer fits.
    w_extra = tile_d * tile_n * c_it
    use_buffered_w = (num_k >= 3 and tile_b <= 128
                      and per_col * tile_d + out_bytes + head + w_extra <= budget)
    if use_buffered_w:
        w_spec = pl.BlockSpec((tile_d, tile_n), lambda b, n, k: (k, n),
                              pipeline_mode=pl.Buffered(3))
    else:
        w_spec = pl.BlockSpec((tile_d, tile_n), lambda b, n, k: (k, n))

    kernel = functools.partial(_gemm_bias_kernel, num_k=num_k)
    out = pl.pallas_call(
        kernel,
        out_shape=jax.ShapeDtypeStruct((b_rows, n_pad), jnp.float32),
        grid_spec=pltpu.PrefetchScalarGridSpec(
            num_scalar_prefetch=0,
            grid=(num_b, num_n, num_k),
            in_specs=[
                pl.BlockSpec((tile_b, tile_d), lambda b, n, k: (b, k)),
                w_spec,
                pl.BlockSpec((1, tile_n), lambda b, n, k: (0, n)),
            ],
            # Output block resident across the reduction axis -> f32 accumulator.
            out_specs=pl.BlockSpec((tile_b, tile_n), lambda b, n, k: (b, n)),
        ),
        compiler_params=pltpu.CompilerParams(
            dimension_semantics=("parallel", "parallel", "arbitrary"),
            vmem_limit_bytes=vmem_limit,
        ),
        cost_estimate=pl.CostEstimate(
            flops=2 * b_rows * d_pad * n_pad,
            transcendentals=0,
            bytes_accessed=(num_n * b_rows * d_pad * c_it
                            + num_b * d_pad * n_pad * c_it
                            + b_rows * n_pad * 4),
        ),
    )(x_c, w_t, b_vec)

    return out[:B, :num_labels]


def linear_classifier_apply(x, weight, bias, *, add_batch_norm=False,
                            compute_dtype=jnp.bfloat16):
    """Convenience wrapper taking raw PyTorch-layout params.
    (Production code should call prepare_linear_params once and reuse it.)"""
    w_t, b_vec, dims = prepare_linear_params(weight, bias, compute_dtype=compute_dtype)
    return linear_classifier_forward(x, w_t, b_vec, dims, add_batch_norm=add_batch_norm)


# TODO(synk): int8 (v5e/v6e) / fp8-e4m3 (v7x) weight quantization in
# prepare_linear_params for the weight-stream-bound small-batch regime.


# ----------------------------- references & test -----------------------------


def _reference(x, weight, bias, *, add_batch_norm, compute_dtype):
    """Pure-JAX reference matching the kernel's precision choices."""
    x2d = x.reshape(x.shape[0], -1).astype(jnp.float32)
    if add_batch_norm:
        mean = jnp.mean(x2d, axis=0, keepdims=True)
        var = jnp.mean((x2d - mean) ** 2, axis=0, keepdims=True)
        x2d = (x2d - mean) * lax.rsqrt(var + BN_EPS)
    y = jnp.dot(
        x2d.astype(compute_dtype),
        weight.T.astype(compute_dtype),
        preferred_element_type=jnp.float32,
    )
    return y + bias.astype(jnp.float32)


def _reference_f32(x, weight, bias, *, add_batch_norm):
    """Full-f32 reference (exact PyTorch semantics)."""
    return _reference(x, weight, bias, add_batch_norm=add_batch_norm,
                      compute_dtype=jnp.float32)


if __name__ == "__main__":
    # Small, deterministic setup consistent with the module:
    #   input x: NCHW (2, 4, 16, 16) -> dim = 4*16*16 = 1024, num_labels = 128
    B, C, H, W = 2, 4, 16, 16
    dim = C * H * W
    num_labels = 128

    key = jax.random.PRNGKey(0)
    kx, kw = jax.random.split(key)

    x = jax.random.normal(kx, (B, C, H, W), dtype=jnp.float32)
    # nn.Linear params, initialized as in __init__: weight ~ N(0, 0.01), bias = 0
    weight = 0.01 * jax.random.normal(kw, (num_labels, dim), dtype=jnp.float32)
    bias = jnp.zeros((num_labels,), dtype=jnp.float32)

    for add_bn in (False, True):
        # bf16 weight/activation-stream path (default).
        y = linear_classifier_apply(x, weight, bias, add_batch_norm=add_bn)
        y = jax.block_until_ready(y)
        assert y.shape == (B, num_labels)
        y_ref_bf16 = _reference(x, weight, bias, add_batch_norm=add_bn,
                                compute_dtype=jnp.bfloat16)
        assert jnp.allclose(y, y_ref_bf16, atol=1e-3, rtol=1e-3), (
            f"bf16-path mismatch (add_batch_norm={add_bn})"
        )
        # Sanity check against exact f32 PyTorch semantics (bf16 rounding only).
        y_ref_f32 = _reference_f32(x, weight, bias, add_batch_norm=add_bn)
        assert jnp.allclose(y, y_ref_f32, atol=3e-2, rtol=3e-2), (
            f"semantic drift vs f32 reference (add_batch_norm={add_bn})"
        )

        # f32 streaming path: must match the f32 reference tightly.
        y32 = linear_classifier_apply(x, weight, bias, add_batch_norm=add_bn,
                                      compute_dtype=jnp.float32)
        y32 = jax.block_until_ready(y32)
        assert jnp.allclose(y32, y_ref_f32, atol=1e-4, rtol=1e-4), (
            f"f32-path mismatch (add_batch_norm={add_bn})"
        )

    print("KERNEL_OK")
</pallas_src>

<mosaic_0001>
module attributes {stable_mosaic.version = 11 : i64} {
  func.func @_gemm_bias_kernel(%arg0: i32, %arg1: i32, %arg2: i32, %arg3: memref<2x1024xbf16, #tpu.memory_space<vmem>>, %arg4: memref<1024x128xbf16, #tpu.memory_space<vmem>>, %arg5: memref<1x128xf32, #tpu.memory_space<vmem>>, %arg6: memref<2x128xf32, #tpu.memory_space<vmem>>) attributes {dimension_semantics = [#tpu.dimension_semantics<parallel>, #tpu.dimension_semantics<parallel>, #tpu.dimension_semantics<arbitrary>], iteration_bounds = array<i64: 1, 1, 1>, scalar_prefetch = 0 : i64, scratch_operands = 0 : i64, tpu.core_type = #tpu.core_type<tc>, window_params = [{transform_indices = @transform_0, window_bounds = array<i64: 2, 1024>}, {transform_indices = @transform_1, window_bounds = array<i64: 1024, 128>}, {transform_indices = @transform_2, window_bounds = array<i64: 1, 128>}, {transform_indices = @transform_3, window_bounds = array<i64: 2, 128>}]} {
    %c0 = arith.constant 0 : index
    %c0_0 = arith.constant 0 : index
    %0 = vector.load %arg3[%c0, %c0_0] : memref<2x1024xbf16, #tpu.memory_space<vmem>>, vector<2x1024xbf16>
    %c0_1 = arith.constant 0 : index
    %c0_2 = arith.constant 0 : index
    %1 = vector.load %arg4[%c0_1, %c0_2] : memref<1024x128xbf16, #tpu.memory_space<vmem>>, vector<1024x128xbf16>
    %cst = arith.constant dense<0.000000e+00> : vector<2x128xf32>
    %2 = tpu.matmul %0, %1, %cst {dimension_numbers = #tpu.dot_dimension_numbers<[1], [0], [0], [1], [0, 0, 1, 1], [], []>} : vector<2x1024xbf16>, vector<1024x128xbf16>, vector<2x128xf32> -> vector<2x128xf32>
    %c0_3 = arith.constant 0 : index
    %c0_4 = arith.constant 0 : index
    %3 = vector.load %arg5[%c0_3, %c0_4] : memref<1x128xf32, #tpu.memory_space<vmem>>, vector<1x128xf32>
    %4 = vector.broadcast %3 : vector<1x128xf32> to vector<2x128xf32>
    %5 = arith.addf %4, %2 : vector<2x128xf32>
    %c0_5 = arith.constant 0 : index
    %c0_6 = arith.constant 0 : index
    %6 = vector.load %arg6[%c0_5, %c0_6] : memref<2x128xf32, #tpu.memory_space<vmem>>, vector<2x128xf32>
    tpu.vector_store %arg6[%c0_5, %c0_6], %5 {strides = array<i32>} : memref<2x128xf32, #tpu.memory_space<vmem>>, vector<2x128xf32>,
    return
  }
  func.func @transform_0(%arg0: i32, %arg1: i32, %arg2: i32) -> (i32, i32) {
    %c0_i32 = arith.constant 0 : i32
    return %arg0, %arg2 : i32, i32
  }
  func.func @transform_1(%arg0: i32, %arg1: i32, %arg2: i32) -> (i32, i32) {
    %c0_i32 = arith.constant 0 : i32
    return %arg2, %arg1 : i32, i32
  }
  func.func @transform_2(%arg0: i32, %arg1: i32, %arg2: i32) -> (i32, i32) {
    %c0_i32 = arith.constant 0 : i32
    %c0_i32_0 = arith.constant 0 : i32
    return %c0_i32, %arg1 : i32, i32
  }
  func.func @transform_3(%arg0: i32, %arg1: i32, %arg2: i32) -> (i32, i32) {
    %c0_i32 = arith.constant 0 : i32
    return %arg0, %arg1 : i32, i32
  }
}

</mosaic_0001>

<bundles_post_ra>
// kernel: tpu_custom_call.1
= control target key start
LH: loop header
LB: loop body
LE: loop exit
PB: predicated region body
PF: predicated region fallthrough
CT: control target
= control target key end

     0   :  { %8 = vsyncpa [#allocation3], 0  ;;  %s1139_s0 = inlined_call_operand.hbm [shape: bf16[2,1024], index: 0, kind: input, shape index: {}]   ;;  %s1140_s1 = inlined_call_operand.hbm [shape: bf16[1024,128], index: 1, kind: input, shape index: {}]   ;;  %s1141_s2 = inlined_call_operand.vmem [shape: f32[1,128], index: 2, kind: input, shape index: {}]   ;;  %s1142_s3 = inlined_call_operand.hbm [shape: f32[2,128], index: 3, kind: output, shape index: {}]  }
   0x1   :  { %9 = vsyncpa [#allocation6], 0 }
   0x2   :  { %10 = vsyncpa [#allocation4], 0  ;;  %s1088_s12 = smov [#allocation2]   ;;  %s1089_s14 = smov [#allocation5]  }
   0x3   :  { %s17_s13 = sshll.u32 %s1088_s12, 4  ;;  %s26_s15 = sshll.u32 %s1089_s14, 4  ;;  %s18_s13 = int_to_ptr.vmem [resolvable:$true] %s17_s13  ;;  %s27_s15 = int_to_ptr.vmem [resolvable:$true] %s26_s15 }
   0x4   :  { %s1030_s16 = scalar_lea.vmem %s18_s13, 128  ;;  %p1035_p1 = scmp.lt.s32.totalorder %s18_s13, %s18_s13 }
   0x5   :  { %p1031_p0 = scmp.ne.s32.totalorder %s18_s13, %s1030_s16  ;;  %p1036_p2 = scmp.lt.s32.totalorder %s1030_s16, %s1030_s16 }
   0x7   :  { %p1037_p3 = por %p1036_p2, %p1035_p1 }
   0x9   :  { %p1038_p4 = pnand %p1037_p3, %p1031_p0 }
   0xb   :  { %1041 = shalt.err (!%p1038_p4)
}
   0xc   :  { %20 = dma.hbm_to_vmem [thread:$0]  %s1139_s0, 128, %s18_s13, [#allocation3]  }
   0xd   :  { %s1050_s19 = scalar_lea.vmem %s27_s15, 8192  ;;  %p1055_p6 = scmp.lt.s32.totalorder %s27_s15, %s27_s15 }
   0xe   :  { %p1051_p5 = scmp.ne.s32.totalorder %s27_s15, %s1050_s19  ;;  %p1056_p7 = scmp.lt.s32.totalorder %s1050_s19, %s1050_s19 }
  0x10   :  { %p1057_p8 = por %p1056_p7, %p1055_p6 }
  0x12   :  { %p1058_p9 = pnand %p1057_p8, %p1051_p5 }
  0x14   :  { %1061 = shalt.err (!%p1058_p9)
}
  0x15   :  { %s1090_s20 = smov 64   ;;  %s1091_s21 = smov 4  }
  0x16   :  { %32 = dma.hbm_to_vmem [thread:$0]  %s1140_s1, 8192, %s27_s15, [#allocation6], %s1090_s20, %s1090_s20, %s1091_s21  }
  0x17   :  { %1082 = dma.done.wait [#allocation3], 128  }
  0x18   :  { %1083 = vsyncadd [#allocation3], 4294967168 }
  0x19   :  { %1084 = dma.done.wait [#allocation6], 8192  }
  0x1a   :  { %1085 = vsyncadd [#allocation6], 4294959104  ;;  %v957_v0 = vld [vmem:[#allocation5 + $0x78] sm:$0xff]   ;;  %v961_v4 = vld [vmem:[#allocation5 + $0x70] sm:$0xff]   ;;  %v1092_v22 = vmov 1966171168   ;;  %v176_v24 = vlaneseq }
  0x1b   :  { %v958_v1 = vld [vmem:[#allocation5 + $0xf8] sm:$0xff]   ;;  %863 = vmatprep.subr.bf16.mxu0 %v957_v0  ;;  %v962_v5 = vld [vmem:[#allocation5 + $0xf0] sm:$0xff]   ;;  %v965_v8 = vld [vmem:[#allocation5 + $0x68] sm:$0xff]   ;;  %v174_v23 = vunpack.c.l.s4 %v1092_v22  ;;  %s1093_s24 = smov [#allocation7]  }
  0x1c   :  { %v959_v2 = vld [vmem:[#allocation5 + $0x38] sm:$0xff]   ;;  %885 = vmatprep.subr.bf16.mxu1 %v958_v1  ;;  %v963_v6 = vld [vmem:[#allocation5 + $0x30] sm:$0xff]   ;;  %v966_v9 = vld [vmem:[#allocation5 + $0xe8] sm:$0xff]   ;;  %v177_v30 = vshrl.u32 %v176_v24, 7  ;;  %s788_s25 = sshll.u32 %s1093_s24, 4  ;;  %s789_s25 = int_to_ptr.vmem [resolvable:$true] %s788_s25 }
  0x1d   :  { %v960_v3 = vld [vmem:[#allocation5 + $0xb8] sm:$0xff]   ;;  %864 = vmatpush3.bf16.msra.mxu0 %v959_v2  ;;  %v964_v7 = vld [vmem:[#allocation5 + $0xb0] sm:$0xff]   ;;  %v967_v10 = vld [vmem:[#allocation5 + $0x28] sm:$0xff]   ;;  %v175_v29 = vunpack.c.0.s8 %v174_v23  ;;  %s1062_s26 = scalar_lea.vmem %s789_s25, 32  ;;  %p1067_p11 = scmp.lt.s32.totalorder %s789_s25, %s789_s25 }
  0x1e   :  { %886 = vmatpush3.bf16.msra.mxu1 %v960_v3  ;;  %865 = vmatprep.subr.bf16.mxu0 %v961_v4  ;;  %v968_v11 = vld [vmem:[#allocation5 + $0xa8] sm:$0xff]   ;;  %v969_v12 = vld [vmem:[#allocation5 + $0x60] sm:$0xff]   ;;  %v973_v16 = vld [vmem:[#allocation5 + $0x58] sm:$0xff]   ;;  %p1063_p10 = scmp.ne.s32.totalorder %s789_s25, %s1062_s26  ;;  %p1068_p12 = scmp.lt.s32.totalorder %s1062_s26, %s1062_s26 }
  0x1f   :  { %887 = vmatprep.subr.bf16.mxu1 %v962_v5  ;;  %v970_v13 = vld [vmem:[#allocation5 + $0xe0] sm:$0xff]   ;;  %v974_v17 = vld [vmem:[#allocation5 + $0xd8] sm:$0xff]   ;;  %v977_v20 = vld [vmem:[#allocation5 + $0x50] sm:$0xff]   ;;  %v1120_v35 = vsub.s32 %v175_v29, %v177_v30 }
  0x20   :  { %v971_v14 = vld [vmem:[#allocation5 + $0x20] sm:$0xff]   ;;  %v975_v18 = vld [vmem:[#allocation5 + $0x18] sm:$0xff]   ;;  %v978_v21 = vld [vmem:[#allocation5 + $0xd0] sm:$0xff]   ;;  %p1069_p13 = por %p1068_p12, %p1067_p11 }
  0x21   :  { %866 = vmatpush3.bf16.msra.mxu0 %v963_v6  ;;  %v972_v15 = vld [vmem:[#allocation5 + $0xa0] sm:$0xff]   ;;  %v976_v19 = vld [vmem:[#allocation5 + $0x98] sm:$0xff]   ;;  %v979_v25 = vld [vmem:[#allocation5 + $0x10] sm:$0xff]  }
  0x22   :  { %888 = vmatpush3.bf16.msra.mxu1 %v964_v7  ;;  %867 = vmatprep.subr.bf16.mxu0 %v965_v8  ;;  %v980_v26 = vld [vmem:[#allocation5 + $0x90] sm:$0xff]   ;;  %v981_v27 = vld [vmem:[#allocation5 + $0x48] sm:$0xff]   ;;  %v985_v33 = vld [vmem:[#allocation5 + $0x40] sm:$0xff]   ;;  %p1070_p0 = pnand %p1069_p13, %p1063_p10 }
  0x23   :  { %889 = vmatprep.subr.bf16.mxu1 %v966_v9  ;;  %v982_v28 = vld [vmem:[#allocation5 + $0xc8] sm:$0xff]   ;;  %v986_v34 = vld [vmem:[#allocation5 + $0xc0] sm:$0xff]   ;;  %v42_v38 = vld [vmem:[#allocation2] sm:$0xff] }
  0x24   :  { %v983_v31 = vld [vmem:[#allocation5 + $0x8] sm:$0xff]   ;;  %v987_v36 = vld [vmem:[#allocation5] sm:$0xff]   ;;  %v172_v39 = vcombine.high %v42_v38, %v42_v38  ;;  %v179_v40 = vrot.slane %v42_v38, %v1120_v35  ;;  %v990_v41 = vld [vmem:[#allocation5 + $0x178] sm:$0xff]  }
  0x25   :  { %868 = vmatpush3.bf16.msra.mxu0 %v967_v10  ;;  %v984_v32 = vld [vmem:[#allocation5 + $0x88] sm:$0xff]   ;;  %v988_v37 = vld [vmem:[#allocation5 + $0x80] sm:$0xff]   ;;  %v991_v42 = vld [vmem:[#allocation5 + $0x1f8] sm:$0xff]  }
  0x26   :  { %890 = vmatpush3.bf16.msra.mxu1 %v968_v11  ;;  %869 = vmatprep.subr.bf16.mxu0 %v969_v12  ;;  %v187_v43 = vcombine.high %v179_v40, %v179_v40  ;;  %v195_v44 = vrot.slane %v179_v40, %v1120_v35  ;;  %v1125_v45 = vrot.slane %v172_v39, %v1120_v35  ;;  %v992_v47 = vld [vmem:[#allocation5 + $0x138] sm:$0xff]   ;;  %v994_v50 = vld [vmem:[#allocation5 + $0x170] sm:$0xff]   ;;  %v998_v57 = vld [vmem:[#allocation5 + $0x168] sm:$0xff]  }
  0x27   :  { %891 = vmatprep.subr.bf16.mxu1 %v970_v13  ;;  %v993_v52 = vld [vmem:[#allocation5 + $0x1b8] sm:$0xff]   ;;  %v995_v54 = vld [vmem:[#allocation5 + $0x1f0] sm:$0xff]   ;;  %v999_v59 = vld [vmem:[#allocation5 + $0x1e8] sm:$0xff]  }
  0x28   :  { %v209_v46 = vrot.slane %v187_v43, %v1120_v35  ;;  %v188_v48 = vcombine.high %v1125_v45, %v1125_v45  ;;  %v217_v49 = vcombine.high %v195_v44, %v195_v44  ;;  %v996_v55 = vld [vmem:[#allocation5 + $0x130] sm:$0xff]   ;;  %v1000_v60 = vld [vmem:[#allocation5 + $0x128] sm:$0xff]   ;;  %v1002_v61 = vld [vmem:[#allocation5 + $0x160] sm:$0xff]  }
  0x29   :  { %870 = vmatpush3.bf16.msra.mxu0 %v971_v14  ;;  %v997_v58 = vld [vmem:[#allocation5 + $0x1b0] sm:$0xff]   ;;  %v1001_v62 = vld [vmem:[#allocation5 + $0x1a8] sm:$0xff]   ;;  %v1003_v63 = vld [vmem:[#allocation5 + $0x1e0] sm:$0xff]  }
  0x2a   :  { %892 = vmatpush3.bf16.msra.mxu1 %v972_v15  ;;  %871 = vmatprep.subr.bf16.mxu0 %v973_v16  ;;  %v219_v51 = vcombine.high %v209_v46, %v209_v46  ;;  %v216_v53 = vrot.slane %v188_v48, %v1120_v35  ;;  %v1004_v0 = vld [vmem:[#allocation5 + $0x120] sm:$0xff]   ;;  %v1006_v1 = vld [vmem:[#allocation5 + $0x158] sm:$0xff]   ;;  %v1010_v5 = vld [vmem:[#allocation5 + $0x150] sm:$0xff]  }
  0x2b   :  { %893 = vmatprep.subr.bf16.mxu1 %v974_v17  ;;  %645 = vmatprep.mubr.bf16.mxu0 %v209_v46  ;;  %v1005_v2 = vld [vmem:[#allocation5 + $0x1a0] sm:$0xff]   ;;  %v1007_v3 = vld [vmem:[#allocation5 + $0x1d8] sm:$0xff]   ;;  %v1011_v7 = vld [vmem:[#allocation5 + $0x1d0] sm:$0xff]   ;;  %v202_v17 = vrot.slane %v1125_v45, %v1120_v35 }
  0x2c   :  { %685 = vmatprep.mubr.bf16.mxu1 %v219_v51  ;;  %v220_v56 = vcombine.high %v216_v53, %v216_v53  ;;  %v1008_v4 = vld [vmem:[#allocation5 + $0x118] sm:$0xff]   ;;  %v1012_v8 = vld [vmem:[#allocation5 + $0x110] sm:$0xff]   ;;  %v1014_v9 = vld [vmem:[#allocation5 + $0x148] sm:$0xff]  }
  0x2d   :  { %872 = vmatpush3.bf16.msra.mxu0 %v975_v18  ;;  %v1009_v6 = vld [vmem:[#allocation5 + $0x198] sm:$0xff]   ;;  %v1013_v10 = vld [vmem:[#allocation5 + $0x190] sm:$0xff]   ;;  %v1015_v11 = vld [vmem:[#allocation5 + $0x1c8] sm:$0xff]  }
  0x2e   :  { %894 = vmatpush3.bf16.msra.mxu1 %v976_v19  ;;  %873 = vmatprep.subr.bf16.mxu0 %v977_v20  ;;  %v1016_v12 = vld [vmem:[#allocation5 + $0x108] sm:$0xff]   ;;  %v1018_v13 = vld [vmem:[#allocation5 + $0x140] sm:$0xff]   ;;  %v218_v19 = vcombine.high %v202_v17, %v202_v17 }
  0x2f   :  { %895 = vmatprep.subr.bf16.mxu1 %v978_v21  ;;  %v1017_v14 = vld [vmem:[#allocation5 + $0x188] sm:$0xff]   ;;  %v1019_v15 = vld [vmem:[#allocation5 + $0x1c0] sm:$0xff]  }
  0x30   :  { %v1020_v16 = vld [vmem:[#allocation5 + $0x100] sm:$0xff]  }
  0x31   :  { %874 = vmatpush3.bf16.msra.mxu0 %v979_v25  ;;  %v1021_v18 = vld [vmem:[#allocation5 + $0x180] sm:$0xff]  }
  0x32   :  { %896 = vmatpush3.bf16.msra.mxu1 %v980_v26  ;;  %875 = vmatprep.subr.bf16.mxu0 %v981_v27 }
  0x33   :  { %897 = vmatprep.subr.bf16.mxu1 %v982_v28 }
  0x35   :  { %876 = vmatpush3.bf16.msra.mxu0 %v983_v31 }
  0x36   :  { %898 = vmatpush3.bf16.msra.mxu1 %v984_v32  ;;  %877 = vmatprep.subr.bf16.mxu0 %v985_v33 }
  0x37   :  { %899 = vmatprep.subr.bf16.mxu1 %v986_v34 }
  0x39   :  { %878 = vmatpush3.bf16.msra.mxu0 %v987_v36 }
  0x3a   :  { %900 = vmatpush3.bf16.msra.mxu1 %v988_v37  ;;  %907 = vmatprep.subr.bf16.mxu0 %v990_v41  ;;  %v862_v41 = vld [vmem:[%s1141_s2] ss:$0 sm:$0xff] }
  0x3b   :  { %929 = vmatprep.subr.bf16.mxu1 %v991_v42 }
  0x3c   :  { %646 = vmatmul.mubr.bf16.vlgmr.msra.gmra.mxu0 %v195_v44 }
  0x3d   :  { %908 = vmatpush3.bf16.msra.mxu0 %v992_v47  ;;  %686 = vmatmul.mubr.bf16.vlgmr.msra.gmra.mxu1 %v217_v49 }
  0x3e   :  { %909 = vmatprep.subr.bf16.mxu0 %v994_v50  ;;  %930 = vmatpush3.bf16.msra.mxu1 %v993_v52 }
  0x3f   :  { %725 = vmatprep.mubr.bf16.mxu0 %v216_v53  ;;  %931 = vmatprep.subr.bf16.mxu1 %v995_v54 }
  0x40   :  { %765 = vmatprep.mubr.bf16.mxu1 %v220_v56 }
  0x41   :  { %910 = vmatpush3.bf16.msra.mxu0 %v996_v55 }
  0x42   :  { %911 = vmatprep.subr.bf16.mxu0 %v998_v57  ;;  %932 = vmatpush3.bf16.msra.mxu1 %v997_v58 }
  0x43   :  { %933 = vmatprep.subr.bf16.mxu1 %v999_v59 }
  0x45   :  { %912 = vmatpush3.bf16.msra.mxu0 %v1000_v60 }
  0x46   :  { %913 = vmatprep.subr.bf16.mxu0 %v1002_v61  ;;  %934 = vmatpush3.bf16.msra.mxu1 %v1001_v62 }
  0x47   :  { %935 = vmatprep.subr.bf16.mxu1 %v1003_v63 }
  0x49   :  { %914 = vmatpush3.bf16.msra.mxu0 %v1004_v0 }
  0x4a   :  { %915 = vmatprep.subr.bf16.mxu0 %v1006_v1  ;;  %936 = vmatpush3.bf16.msra.mxu1 %v1005_v2 }
  0x4b   :  { %937 = vmatprep.subr.bf16.mxu1 %v1007_v3 }
  0x4d   :  { %916 = vmatpush3.bf16.msra.mxu0 %v1008_v4 }
  0x4e   :  { %917 = vmatprep.subr.bf16.mxu0 %v1010_v5  ;;  %938 = vmatpush3.bf16.msra.mxu1 %v1009_v6 }
  0x4f   :  { %939 = vmatprep.subr.bf16.mxu1 %v1011_v7 }
  0x51   :  { %918 = vmatpush3.bf16.msra.mxu0 %v1012_v8 }
  0x52   :  { %919 = vmatprep.subr.bf16.mxu0 %v1014_v9  ;;  %940 = vmatpush3.bf16.msra.mxu1 %v1013_v10 }
  0x53   :  { %941 = vmatprep.subr.bf16.mxu1 %v1015_v11 }
  0x55   :  { %920 = vmatpush3.bf16.msra.mxu0 %v1016_v12 }
  0x56   :  { %921 = vmatprep.subr.bf16.mxu0 %v1018_v13  ;;  %942 = vmatpush3.bf16.msra.mxu1 %v1017_v14 }
  0x57   :  { %943 = vmatprep.subr.bf16.mxu1 %v1019_v15 }
  0x59   :  { %922 = vmatpush3.bf16.msra.mxu0 %v1020_v16 }
  0x5a   :  { %944 = vmatpush3.bf16.msra.mxu1 %v1021_v18 }
  0x5c   :  { %726 = vmatmul.mubr.bf16.vlgmr.msra.gmra.mxu0 %v202_v17 }
  0x5d   :  { %766 = vmatmul.mubr.bf16.vlgmr.msra.gmra.mxu1 %v218_v19 }
  0xfc   :  { %v879_v20 = vpop.f32.mrf.mxu0 }
  0xfd   :  { %v901_v21 = vpop.f32.mrf.mxu1 }
  0xfe   :  { %v880_v22 = vpop.f32.mrf.mxu0 }
  0xff   :  { %v902_v23 = vpop.f32.mrf.mxu1  ;;  %v881_v28 = vadd.f32 %v880_v22, %v879_v20 }
 0x100   :  { %v882_v24 = vpop.f32.mrf.mxu0  ;;  %v903_v29 = vadd.f32 %v902_v23, %v901_v21 }
 0x101   :  { %v904_v25 = vpop.f32.mrf.mxu1 }
 0x102   :  { %v883_v26 = vpop.f32.mrf.mxu0  ;;  %v688_v33 = vadd.f32 %v903_v29, %v881_v28 }
 0x103   :  { %v905_v27 = vpop.f32.mrf.mxu1 }
 0x11c   :  { %v923_v30 = vpop.f32.mrf.mxu0 }
 0x11d   :  { %v945_v31 = vpop.f32.mrf.mxu1 }
 0x11e   :  { %v924_v32 = vpop.f32.mrf.mxu0 }
 0x11f   :  { %v925_v34 = vadd.f32 %v924_v32, %v923_v30  ;;  %v946_v35 = vpop.f32.mrf.mxu1 }
 0x120   :  { %v926_v36 = vpop.f32.mrf.mxu0  ;;  %v947_v38 = vadd.f32 %v946_v35, %v945_v31 }
 0x121   :  { %v728_v37 = vadd.f32 %v925_v34, %v688_v33  ;;  %v948_v39 = vpop.f32.mrf.mxu1 }
 0x122   :  { %v927_v40 = vpop.f32.mrf.mxu0 }
 0x123   :  { %v768_v42 = vadd.f32 %v947_v38, %v728_v37  ;;  %v949_v43 = vpop.f32.mrf.mxu1 }
 0x125   :  { %v780_v44 = vadd.f32 %v862_v41, %v768_v42 }
 0x127   :  { %781 = vst [vmem:[#allocation7] sm:$0x3] %v780_v44 }
 0x128   :  { %1073 = shalt.err (!%p1070_p0)
}
 0x129   :  { %791 = dma.vmem_to_hbm [thread:$0]  %s789_s25, 32, %s1142_s3, [#allocation4]  }
 0x12a   :  { %1086 = dma.done.wait [#allocation4], 32  }
 0x12b   :  { %1087 = vsyncadd [#allocation4], 4294967264 }
 0x12c   :  { %795 = vsyncpa [#allocation3], 1 }
 0x12d   :  { %796 = vsyncpa [#allocation6], 1 }
 0x12e   :  { %797 = vsyncpa [#allocation4], 1 }

</bundles_post_ra>
